<compile_context>
chip_gen: v7x
topology: tpu7x:2x2x1
jax: 0.10.0
libtpu: 0.0.40
codegen_flags: <defaults>
</compile_context>

<pallas_src>
import math
import functools

import jax
import jax.numpy as jnp
from jax.experimental import pallas as pl
from jax.experimental.pallas import tpu as pltpu


# Tables at or below this size are kept VMEM-resident (safe on v5e/v6e/v7x,
# leaving room for double-buffered tiles even under v7x's 64 MiB VMEM).
_RESIDENT_TABLE_LIMIT_BYTES = 24 << 20


# --------------------------------------------------------------------------
# Fast path: VMEM-resident table, one-hot MXU gather, T tokens per grid step.
# --------------------------------------------------------------------------
def _embed_onehot_kernel(ids_ref, lut_ref, out_ref, *, scale):
    # ids_ref : VMEM (T, 1)        int32 token ids for this tile
    # lut_ref : VMEM (V_pad, D)    whole (padded) embedding table, resident
    # out_ref : VMEM (T, D)        output tile
    ids = ids_ref[...]                                   # (T, 1)
    t = ids.shape[0]
    v = lut_ref.shape[0]
    # one-hot(ids) via 2-D iota + compare (VPU), then a single MXU matmul.
    iota = jax.lax.broadcasted_iota(jnp.int32, (t, v), 1)
    onehot = (iota == ids).astype(lut_ref.dtype)          # (T, V_pad)
    acc = jnp.dot(onehot, lut_ref[...],
                  preferred_element_type=jnp.float32)     # (T, D) in f32
    out_ref[...] = (acc * scale).astype(out_ref.dtype)    # scale in f32, cast


def _embed_resident_onehot(flat_ids, lut, scale, tokens_per_tile):
    n = flat_ids.shape[0]
    vocab, d_model = lut.shape
    t = tokens_per_tile
    n_pad = ((n + t - 1) // t) * t
    v_pad = ((vocab + 127) // 128) * 128                  # lane-align MXU K dim

    # Pad ids (index 0 is valid; padded rows are sliced off afterwards) and
    # pad the table's vocab axis with zeros.
    ids = jnp.zeros((n_pad, 1), jnp.int32).at[:n, 0].set(flat_ids.astype(jnp.int32))
    lut_p = lut if v_pad == vocab else jnp.pad(lut, ((0, v_pad - vocab), (0, 0)))

    num_tiles = n_pad // t
    dsize = jnp.dtype(lut.dtype).itemsize
    vmem_need = (v_pad * d_model * dsize        # resident table
                 + 2 * t * d_model * dsize      # double-buffered output tiles
                 + 2 * t * 4                    # double-buffered id tiles
                 + t * v_pad * dsize)           # in-kernel one-hot temporary
    vmem_limit = int(min(max(vmem_need + (8 << 20), 32 << 20), 56 << 20))

    kernel = functools.partial(_embed_onehot_kernel, scale=scale)

    out = pl.pallas_call(
        kernel,
        out_shape=jax.ShapeDtypeStruct((n_pad, d_model), lut.dtype),
        grid_spec=pltpu.PrefetchScalarGridSpec(
            num_scalar_prefetch=0,
            grid=(num_tiles,),
            in_specs=[
                # Token-id tile for this step.
                pl.BlockSpec((t, 1), lambda i: (i, 0)),
                # Whole table, constant block index -> DMA'd once, VMEM-resident.
                pl.BlockSpec((v_pad, d_model), lambda i: (0, 0)),
            ],
            out_specs=pl.BlockSpec((t, d_model), lambda i: (i, 0)),
        ),
        compiler_params=pltpu.CompilerParams(
            dimension_semantics=("parallel",),   # unique tile per step; v7x 2-TC
            vmem_limit_bytes=vmem_limit,
        ),
    )(ids, lut_p)

    return out[:n]


# --------------------------------------------------------------------------
# Fallback path (table too big for VMEM): scalar-prefetch per-row gather with
# a deeper input pipeline.  Table stays in HBM; each step DMAs exactly one row.
# --------------------------------------------------------------------------
def _embed_row_kernel(ids_ref, row_ref, out_ref, *, scale):
    del ids_ref  # gather already done by the BlockSpec index_map
    out_ref[...] = (row_ref[...].astype(jnp.float32) * scale).astype(out_ref.dtype)


def _embed_row_gather(flat_ids, lut, scale):
    n = flat_ids.shape[0]
    vocab, d_model = lut.shape
    ids = flat_ids.astype(jnp.int32)
    kernel = functools.partial(_embed_row_kernel, scale=scale)
    # TODO(synk): a higher-throughput large-vocab variant would batch T rows
    # per step with manual multi-row make_async_copy DMAs into VMEM scratch.
    return pl.pallas_call(
        kernel,
        out_shape=jax.ShapeDtypeStruct((n, d_model), lut.dtype),
        grid_spec=pltpu.PrefetchScalarGridSpec(
            num_scalar_prefetch=1,             # flat ids -> SMEM, fed to index_maps
            grid=(n,),
            in_specs=[
                pl.BlockSpec((1, d_model), lambda i, ids: (ids[i], 0),
                             pipeline_mode=pl.Buffered(4)),
            ],
            out_specs=pl.BlockSpec((1, d_model), lambda i, ids: (i, 0)),
        ),
        compiler_params=pltpu.CompilerParams(
            dimension_semantics=("arbitrary",),
        ),
    )(ids, lut)


# --------------------------------------------------------------------------
# Public wrapper: out = lut[x] * sqrt(d_model)
# --------------------------------------------------------------------------
def embeddings_forward(x, lut, *, tokens_per_tile=128):
    """x: (batch, seq) int indices; lut: (vocab, d_model) float table."""
    batch, seq = x.shape
    vocab, d_model = lut.shape
    n = batch * seq
    flat_ids = x.reshape(n)
    scale = float(math.sqrt(d_model))

    table_bytes = vocab * d_model * jnp.dtype(lut.dtype).itemsize
    if table_bytes <= _RESIDENT_TABLE_LIMIT_BYTES:
        out_flat = _embed_resident_onehot(flat_ids, lut, scale, tokens_per_tile)
    else:
        out_flat = _embed_row_gather(flat_ids, lut, scale)

    return out_flat.reshape(batch, seq, d_model)


if __name__ == "__main__":
    vocab, d_model = 64, 32
    batch, seq = 2, 8

    key = jax.random.PRNGKey(0)
    k_lut, k_idx = jax.random.split(key)

    # Deterministic "nn.Embedding" weight (synthetic, N(0,1) like PyTorch init).
    lut = jax.random.normal(k_lut, (vocab, d_model), dtype=jnp.float32)
    # Deterministic integer token ids.
    x = jax.random.randint(k_idx, (batch, seq), 0, vocab, dtype=jnp.int32)

    out = embeddings_forward(x, lut)
    out = jax.block_until_ready(out)

    # Pure-JAX reference check of the exact PyTorch semantics.
    ref = jnp.take(lut, x, axis=0) * math.sqrt(d_model)
    assert out.shape == (batch, seq, d_model)
    assert out.dtype == lut.dtype
    assert jnp.allclose(out, ref, atol=1e-5, rtol=1e-5)

    print("KERNEL_OK")
</pallas_src>

<mosaic_0001>
module attributes {stable_mosaic.version = 11 : i64} {
  func.func @_embed_onehot_kernel(%arg0: i32, %arg1: memref<128x1xi32, #tpu.memory_space<vmem>>, %arg2: memref<128x32xf32, #tpu.memory_space<vmem>>, %arg3: memref<128x32xf32, #tpu.memory_space<vmem>>) attributes {dimension_semantics = [#tpu.dimension_semantics<parallel>], iteration_bounds = array<i64: 1>, scalar_prefetch = 0 : i64, scratch_operands = 0 : i64, tpu.core_type = #tpu.core_type<tc>, window_params = [{transform_indices = @transform_0, window_bounds = array<i64: 128, 1>}, {pipeline_mode = #tpu.pipeline_mode<synchronous>, transform_indices = @transform_1, window_bounds = array<i64: 128, 32>}, {transform_indices = @transform_2, window_bounds = array<i64: 128, 32>}]} {
    %c0 = arith.constant 0 : index
    %c0_0 = arith.constant 0 : index
    %0 = vector.load %arg1[%c0, %c0_0] : memref<128x1xi32, #tpu.memory_space<vmem>>, vector<128x1xi32>
    %1 = tpu.iota {dimensions = array<i32: 1>} : vector<128x128xi32>
    %2 = vector.broadcast %0 : vector<128x1xi32> to vector<128x128xi32>
    %3 = arith.cmpi eq, %1, %2 : vector<128x128xi32>
    %4 = arith.extui %3 : vector<128x128xi1> to vector<128x128xi32>
    %5 = arith.sitofp %4 : vector<128x128xi32> to vector<128x128xf32>
    %c0_1 = arith.constant 0 : index
    %c0_2 = arith.constant 0 : index
    %6 = vector.load %arg2[%c0_1, %c0_2] : memref<128x32xf32, #tpu.memory_space<vmem>>, vector<128x32xf32>
    %cst = arith.constant dense<0.000000e+00> : vector<128x32xf32>
    %7 = tpu.matmul %5, %6, %cst {dimension_numbers = #tpu.dot_dimension_numbers<[1], [0], [0], [1], [0, 0, 1, 1], [], []>} : vector<128x128xf32>, vector<128x32xf32>, vector<128x32xf32> -> vector<128x32xf32>
    %cst_3 = arith.constant 5.65685415 : f32
    %8 = vector.broadcast %cst_3 : f32 to vector<128x32xf32>
    %9 = arith.mulf %7, %8 : vector<128x32xf32>
    %c0_4 = arith.constant 0 : index
    %c0_5 = arith.constant 0 : index
    %10 = vector.load %arg3[%c0_4, %c0_5] : memref<128x32xf32, #tpu.memory_space<vmem>>, vector<128x32xf32>
    tpu.vector_store %arg3[%c0_4, %c0_5], %9 {strides = array<i32>} : memref<128x32xf32, #tpu.memory_space<vmem>>, vector<128x32xf32>,
    return
  }
  func.func @transform_0(%arg0: i32) -> (i32, i32) {
    %c0_i32 = arith.constant 0 : i32
    %c0_i32_0 = arith.constant 0 : i32
    return %arg0, %c0_i32 : i32, i32
  }
  func.func @transform_1(%arg0: i32) -> (i32, i32) {
    %c0_i32 = arith.constant 0 : i32
    %c0_i32_0 = arith.constant 0 : i32
    %c0_i32_1 = arith.constant 0 : i32
    return %c0_i32, %c0_i32_0 : i32, i32
  }
  func.func @transform_2(%arg0: i32) -> (i32, i32) {
    %c0_i32 = arith.constant 0 : i32
    %c0_i32_0 = arith.constant 0 : i32
    return %arg0, %c0_i32 : i32, i32
  }
}

</mosaic_0001>

<bundles_post_ra>
// kernel: tpu_custom_call.1
= control target key start
LH: loop header
LB: loop body
LE: loop exit
PB: predicated region body
PF: predicated region fallthrough
CT: control target
= control target key end

     0   :  { %v495_v0 = vmov 0   ;;  %v27_v41 = vlaneseq  ;;  %v496_v45 = vmov 1.0   ;;  %s672_s0 = inlined_call_operand.vmem [shape: s32[128,1], index: 0, kind: input, shape index: {}]   ;;  %s673_s1 = inlined_call_operand.vmem [shape: f32[128,32], index: 1, kind: input, shape index: {}]   ;;  %s674_s2 = inlined_call_operand.vmem [shape: f32[128,32], index: 2, kind: output, shape index: {}]  }
   0x1   :  { %494 = vset.pattern.permute.xlu1 %v495_v0  ;;  %493 = vset.pattern.permute.xlu0 %v495_v0  ;;  %v12_v1 = vld [vmem:[%s672_s0 + $0x8] sm:$0xff]  ;;  %v11_v2 = vld [vmem:[%s672_s0] sm:$0xff]  ;;  %v21_v5 = vld [vmem:[%s672_s0 + $0x50] sm:$0xff] }
   0x2   :  { %33 = vperm.xlu1 %494, %v12_v1   ;;  %30 = vperm.xlu0 %493, %v11_v2   ;;  %v20_v3 = vld [vmem:[%s672_s0 + $0x48] sm:$0xff]  ;;  %v19_v4 = vld [vmem:[%s672_s0 + $0x40] sm:$0xff]  ;;  %v13_v8 = vld [vmem:[%s672_s0 + $0x10] sm:$0xff]  ;;  %v28_v42 = vand.u32 127, %v27_v41 }
   0x3   :  { %v125_v6 = vld [vmem:[%s673_s1] sm:$0xff]  ;;  %v126_v7 = vld [vmem:[%s673_s1 + $0x8] sm:$0xff]  ;;  %v127_v10 = vld [vmem:[%s673_s1 + $0x10] sm:$0xff] }
   0x4   :  { %v443_v9 = vpack.c.bf16 %v126_v7, %v125_v6  ;;  %v128_v11 = vld [vmem:[%s673_s1 + $0x18] sm:$0xff]  ;;  %v129_v13 = vld [vmem:[%s673_s1 + $0x20] sm:$0xff]  ;;  %v130_v14 = vld [vmem:[%s673_s1 + $0x28] sm:$0xff] }
   0x5   :  { %v447_v12 = vpack.c.bf16 %v128_v11, %v127_v10  ;;  %v22_v15 = vld [vmem:[%s672_s0 + $0x58] sm:$0xff]  ;;  %v451_v17 = vpack.c.bf16 %v130_v14, %v129_v13  ;;  %v131_v18 = vld [vmem:[%s673_s1 + $0x30] sm:$0xff]  ;;  %v23_v20 = vld [vmem:[%s672_s0 + $0x60] sm:$0xff] }
   0x6   :  { %57 = vperm.xlu1 %494, %v20_v3   ;;  %54 = vperm.xlu0 %493, %v19_v4   ;;  %v14_v16 = vld [vmem:[%s672_s0 + $0x18] sm:$0xff]  ;;  %v15_v21 = vld [vmem:[%s672_s0 + $0x20] sm:$0xff]  ;;  %v134_v24 = vld [vmem:[%s673_s1 + $0x48] sm:$0xff] }
   0x7   :  { %444 = vmatprep.subr.bf16.mxu0 %v443_v9  ;;  %475 = vmatprep.subr.bf16.mxu1 %v443_v9  ;;  %v132_v19 = vld [vmem:[%s673_s1 + $0x38] sm:$0xff]  ;;  %v133_v23 = vld [vmem:[%s673_s1 + $0x40] sm:$0xff]  ;;  %v24_v25 = vld [vmem:[%s672_s0 + $0x68] sm:$0xff] }
   0x8   :  { %446 = vmatpush3.bf16.msra.mxu0 %v443_v9  ;;  %483 = vmatpush3.bf16.msra.mxu1 %v443_v9  ;;  %v455_v22 = vpack.c.bf16 %v132_v19, %v131_v18  ;;  %v16_v26 = vld [vmem:[%s672_s0 + $0x28] sm:$0xff]  ;;  %v459_v27 = vpack.c.bf16 %v134_v24, %v133_v23  ;;  %v135_v28 = vld [vmem:[%s673_s1 + $0x50] sm:$0xff]  ;;  %v136_v29 = vld [vmem:[%s673_s1 + $0x58] sm:$0xff] }
   0x9   :  { %448 = vmatprep.subr.bf16.mxu0 %v447_v12  ;;  %476 = vmatprep.subr.bf16.mxu1 %v447_v12  ;;  %v25_v30 = vld [vmem:[%s672_s0 + $0x70] sm:$0xff]  ;;  %v463_v32 = vpack.c.bf16 %v136_v29, %v135_v28  ;;  %v137_v33 = vld [vmem:[%s673_s1 + $0x60] sm:$0xff]  ;;  %v138_v34 = vld [vmem:[%s673_s1 + $0x68] sm:$0xff] }
   0xa   :  { %60 = vperm.xlu1 %494, %v21_v5   ;;  %36 = vperm.xlu0 %493, %v13_v8   ;;  %v17_v31 = vld [vmem:[%s672_s0 + $0x30] sm:$0xff]  ;;  %v26_v35 = vld [vmem:[%s672_s0 + $0x78] sm:$0xff]  ;;  %v467_v37 = vpack.c.bf16 %v138_v34, %v137_v33 }
   0xb   :  { %v18_v36 = vld [vmem:[%s672_s0 + $0x38] sm:$0xff]  ;;  %v139_v38 = vld [vmem:[%s673_s1 + $0x70] sm:$0xff] }
   0xc   :  { %450 = vmatpush3.bf16.msra.mxu0 %v447_v12  ;;  %484 = vmatpush3.bf16.msra.mxu1 %v447_v12  ;;  %v140_v39 = vld [vmem:[%s673_s1 + $0x78] sm:$0xff] }
   0xd   :  { %452 = vmatprep.subr.bf16.mxu0 %v451_v17  ;;  %477 = vmatprep.subr.bf16.mxu1 %v451_v17  ;;  %v471_v40 = vpack.c.bf16 %v140_v39, %v139_v38 }
   0xe   :  { %63 = vperm.xlu1 %494, %v22_v15   ;;  %39 = vperm.xlu0 %493, %v14_v16  }
  0x10   :  { %454 = vmatpush3.bf16.msra.mxu0 %v451_v17  ;;  %485 = vmatpush3.bf16.msra.mxu1 %v451_v17 }
  0x11   :  { %456 = vmatprep.subr.bf16.mxu0 %v455_v22  ;;  %478 = vmatprep.subr.bf16.mxu1 %v455_v22 }
  0x12   :  { %66 = vperm.xlu1 %494, %v23_v20   ;;  %42 = vperm.xlu0 %493, %v15_v21  }
  0x14   :  { %458 = vmatpush3.bf16.msra.mxu0 %v455_v22  ;;  %486 = vmatpush3.bf16.msra.mxu1 %v455_v22 }
  0x15   :  { %460 = vmatprep.subr.bf16.mxu0 %v459_v27  ;;  %479 = vmatprep.subr.bf16.mxu1 %v459_v27 }
  0x16   :  { %69 = vperm.xlu1 %494, %v24_v25   ;;  %45 = vperm.xlu0 %493, %v16_v26  }
  0x18   :  { %462 = vmatpush3.bf16.msra.mxu0 %v459_v27  ;;  %487 = vmatpush3.bf16.msra.mxu1 %v459_v27 }
  0x19   :  { %464 = vmatprep.subr.bf16.mxu0 %v463_v32  ;;  %480 = vmatprep.subr.bf16.mxu1 %v463_v32 }
  0x1a   :  { %72 = vperm.xlu1 %494, %v25_v30   ;;  %48 = vperm.xlu0 %493, %v17_v31  }
  0x1c   :  { %466 = vmatpush3.bf16.msra.mxu0 %v463_v32  ;;  %488 = vmatpush3.bf16.msra.mxu1 %v463_v32 }
  0x1d   :  { %468 = vmatprep.subr.bf16.mxu0 %v467_v37  ;;  %481 = vmatprep.subr.bf16.mxu1 %v467_v37 }
  0x1e   :  { %75 = vperm.xlu1 %494, %v26_v35   ;;  %51 = vperm.xlu0 %493, %v18_v36  }
  0x20   :  { %470 = vmatpush3.bf16.msra.mxu0 %v467_v37  ;;  %489 = vmatpush3.bf16.msra.mxu1 %v467_v37 }
  0x21   :  { %472 = vmatprep.subr.bf16.mxu0 %v471_v40  ;;  %482 = vmatprep.subr.bf16.mxu1 %v471_v40 }
  0x24   :  { %474 = vmatpush3.bf16.msra.mxu0 %v471_v40  ;;  %490 = vmatpush3.bf16.msra.mxu1 %v471_v40 }
  0x81   :  { %v34_v43 = vpop.permute.xlu1 %33  ;;  %v31_v44 = vpop.permute.xlu0 %30 }
  0x82   :  { %vm78_vm0 = vcmp.eq.s32.totalorder %v28_v42, %v34_v43  ;;  %vm77_vm1 = vcmp.eq.s32.totalorder %v28_v42, %v31_v44 }
  0x83   :  { %419 = vmatprep.mubr.msk.f32.mxu0 %vm77_vm1, %v496_v45 }
  0x84   :  { %420 = vmatmul.mubr.msk.f32.vlgmr.msra.gmra.mrb[0].mxu0 %vm78_vm0, %v496_v45  ;;  %vm302_vm0 = vcmask 261120  }
  0x85   :  { %v58_v46 = vpop.permute.xlu1 %57  ;;  %v55_v47 = vpop.permute.xlu0 %54 }
  0x86   :  { %vm86_vm2 = vcmp.eq.s32.totalorder %v28_v42, %v58_v46  ;;  %vm85_vm3 = vcmp.eq.s32.totalorder %v28_v42, %v55_v47 }
  0x87   :  { %431 = vmatprep.mubr.msk.f32.mxu1 %vm85_vm3, %v496_v45 }
  0x88   :  { %432 = vmatmul.mubr.msk.f32.vlgmr.msra.gmra.mrb[0].mxu1 %vm86_vm2, %v496_v45 }
  0x89   :  { %v61_v48 = vpop.permute.xlu1 %60  ;;  %v37_v49 = vpop.permute.xlu0 %36 }
  0x8a   :  { %vm87_vm4 = vcmp.eq.s32.totalorder %v28_v42, %v61_v48  ;;  %vm79_vm5 = vcmp.eq.s32.totalorder %v28_v42, %v37_v49 }
  0x8b   :  { %422 = vmatprep.mubr.msk.f32.mxu0 %vm79_vm5, %v496_v45  ;;  %434 = vmatprep.mubr.msk.f32.mxu1 %vm87_vm4, %v496_v45 }
  0x8d   :  { %v64_v50 = vpop.permute.xlu1 %63  ;;  %v40_v51 = vpop.permute.xlu0 %39 }
  0x8e   :  { %vm88_vm6 = vcmp.eq.s32.totalorder %v28_v42, %v64_v50  ;;  %vm80_vm7 = vcmp.eq.s32.totalorder %v28_v42, %v40_v51 }
  0x8f   :  { %423 = vmatmul.mubr.msk.f32.gmra.mrb[2].mxu0 %vm80_vm7, %v496_v45  ;;  %435 = vmatmul.mubr.msk.f32.gmra.mrb[2].mxu1 %vm88_vm6, %v496_v45 }
  0x91   :  { %v67_v52 = vpop.permute.xlu1 %66  ;;  %v43_v53 = vpop.permute.xlu0 %42 }
  0x92   :  { %vm89_vm8 = vcmp.eq.s32.totalorder %v28_v42, %v67_v52  ;;  %vm81_vm9 = vcmp.eq.s32.totalorder %v28_v42, %v43_v53 }
  0x93   :  { %425 = vmatprep.mubr.msk.f32.mxu0 %vm81_vm9, %v496_v45  ;;  %437 = vmatprep.mubr.msk.f32.mxu1 %vm89_vm8, %v496_v45 }
  0x95   :  { %v70_v54 = vpop.permute.xlu1 %69  ;;  %v46_v55 = vpop.permute.xlu0 %45 }
  0x96   :  { %vm90_vm10 = vcmp.eq.s32.totalorder %v28_v42, %v70_v54  ;;  %vm82_vm11 = vcmp.eq.s32.totalorder %v28_v42, %v46_v55 }
  0x97   :  { %426 = vmatmul.mubr.msk.f32.gmra.mrb[4].mxu0 %vm82_vm11, %v496_v45  ;;  %438 = vmatmul.mubr.msk.f32.gmra.mrb[4].mxu1 %vm90_vm10, %v496_v45 }
  0x99   :  { %v73_v56 = vpop.permute.xlu1 %72  ;;  %v49_v57 = vpop.permute.xlu0 %48 }
  0x9a   :  { %vm91_vm12 = vcmp.eq.s32.totalorder %v28_v42, %v73_v56  ;;  %vm83_vm13 = vcmp.eq.s32.totalorder %v28_v42, %v49_v57 }
  0x9b   :  { %428 = vmatprep.mubr.msk.f32.mxu0 %vm83_vm13, %v496_v45  ;;  %440 = vmatprep.mubr.msk.f32.mxu1 %vm91_vm12, %v496_v45 }
  0x9d   :  { %v76_v58 = vpop.permute.xlu1 %75  ;;  %v52_v59 = vpop.permute.xlu0 %51 }
  0x9e   :  { %vm92_vm14 = vcmp.eq.s32.totalorder %v28_v42, %v76_v58  ;;  %vm84_vm15 = vcmp.eq.s32.totalorder %v28_v42, %v52_v59 }
  0x9f   :  { %429 = vmatmul.mubr.msk.f32.gmra.mrb[6].mxu0 %vm84_vm15, %v496_v45  ;;  %441 = vmatmul.mubr.msk.f32.gmra.mrb[6].mxu1 %vm92_vm14, %v496_v45 }
 0x157   :  { %v421_v60 = vpop.f32.mrb[0].mxu0 }
 0x158   :  { %v287_v61 = vmul.f32 5.656854, %v421_v60  ;;  %v207_v62 = vpop.f32.mrb[1].mxu0 }
 0x159   :  { %v286_v63 = vmul.f32 5.656854, %v207_v62 }
 0x15a   :  { %304 = vst.msk [vmem:[%s674_s2 + $0x8] sm:$0xff] %vm302_vm0, %v287_v61 }
 0x15b   :  { %303 = vst.msk [vmem:[%s674_s2] sm:$0xff] %vm302_vm0, %v286_v63  ;;  %v433_v0 = vpop.f32.mrb[0].mxu1 }
 0x15c   :  { %v295_v1 = vmul.f32 5.656854, %v433_v0  ;;  %v247_v2 = vpop.f32.mrb[1].mxu1 }
 0x15d   :  { %v294_v3 = vmul.f32 5.656854, %v247_v2 }
 0x15e   :  { %312 = vst.msk [vmem:[%s674_s2 + $0x48] sm:$0xff] %vm302_vm0, %v295_v1 }
 0x15f   :  { %311 = vst.msk [vmem:[%s674_s2 + $0x40] sm:$0xff] %vm302_vm0, %v294_v3 }
 0x162   :  { %v424_v4 = vpop.f32.mrb[2].mxu0  ;;  %v436_v5 = vpop.f32.mrb[2].mxu1 }
 0x163   :  { %v289_v6 = vmul.f32 5.656854, %v424_v4  ;;  %v297_v7 = vmul.f32 5.656854, %v436_v5  ;;  %v217_v8 = vpop.f32.mrb[3].mxu0  ;;  %v257_v9 = vpop.f32.mrb[3].mxu1 }
 0x164   :  { %v288_v10 = vmul.f32 5.656854, %v217_v8  ;;  %v296_v11 = vmul.f32 5.656854, %v257_v9 }
 0x165   :  { %306 = vst.msk [vmem:[%s674_s2 + $0x18] sm:$0xff] %vm302_vm0, %v289_v6  ;;  %314 = vst.msk [vmem:[%s674_s2 + $0x58] sm:$0xff] %vm302_vm0, %v297_v7 }
 0x166   :  { %305 = vst.msk [vmem:[%s674_s2 + $0x10] sm:$0xff] %vm302_vm0, %v288_v10  ;;  %313 = vst.msk [vmem:[%s674_s2 + $0x50] sm:$0xff] %vm302_vm0, %v296_v11 }
 0x16a   :  { %v427_v12 = vpop.f32.mrb[4].mxu0  ;;  %v439_v13 = vpop.f32.mrb[4].mxu1 }
 0x16b   :  { %v291_v14 = vmul.f32 5.656854, %v427_v12  ;;  %v299_v15 = vmul.f32 5.656854, %v439_v13  ;;  %v227_v16 = vpop.f32.mrb[5].mxu0  ;;  %v267_v17 = vpop.f32.mrb[5].mxu1 }
 0x16c   :  { %v290_v18 = vmul.f32 5.656854, %v227_v16  ;;  %v298_v19 = vmul.f32 5.656854, %v267_v17 }
 0x16d   :  { %308 = vst.msk [vmem:[%s674_s2 + $0x28] sm:$0xff] %vm302_vm0, %v291_v14  ;;  %316 = vst.msk [vmem:[%s674_s2 + $0x68] sm:$0xff] %vm302_vm0, %v299_v15 }
 0x16e   :  { %307 = vst.msk [vmem:[%s674_s2 + $0x20] sm:$0xff] %vm302_vm0, %v290_v18  ;;  %315 = vst.msk [vmem:[%s674_s2 + $0x60] sm:$0xff] %vm302_vm0, %v298_v19 }
 0x172   :  { %v430_v20 = vpop.f32.mrb[6].mxu0  ;;  %v442_v21 = vpop.f32.mrb[6].mxu1 }
 0x173   :  { %v293_v22 = vmul.f32 5.656854, %v430_v20  ;;  %v301_v23 = vmul.f32 5.656854, %v442_v21  ;;  %v237_v24 = vpop.f32.mrb[7].mxu0  ;;  %v277_v25 = vpop.f32.mrb[7].mxu1 }
 0x174   :  { %v292_v26 = vmul.f32 5.656854, %v237_v24  ;;  %v300_v27 = vmul.f32 5.656854, %v277_v25 }
 0x175   :  { %310 = vst.msk [vmem:[%s674_s2 + $0x38] sm:$0xff] %vm302_vm0, %v293_v22  ;;  %318 = vst.msk [vmem:[%s674_s2 + $0x78] sm:$0xff] %vm302_vm0, %v301_v23 }
 0x176   :  { %309 = vst.msk [vmem:[%s674_s2 + $0x30] sm:$0xff] %vm302_vm0, %v292_v26  ;;  %317 = vst.msk [vmem:[%s674_s2 + $0x70] sm:$0xff] %vm302_vm0, %v300_v27 }

</bundles_post_ra>
